<compile_context>
chip_gen: v7x
topology: tpu7x:2x2x1
jax: 0.10.0
libtpu: 0.0.40
codegen_flags: <defaults>
</compile_context>

<pallas_src>
import functools

import jax
import jax.numpy as jnp
from jax import lax
from jax.experimental import pallas as pl
from jax.experimental.pallas import tpu as pltpu


# ---------------------------------------------------------------------------
# Fused kernel: m_norm computation + x@W + m_norm contraction + bias + relu.
# ---------------------------------------------------------------------------
def _gcn_kernel(adj_ref, x_ref, w_ref, b_ref, o_ref, *, alpha, n, v):
    f32 = jnp.float32
    adj = adj_ref[...].astype(f32)     # (V, V)
    x = x_ref[...].astype(f32)         # (N*V, D_in)   row order: [n*V + i]
    w = w_ref[...].astype(f32)         # (D_in, D_out)
    b = b_ref[...].astype(f32)         # (1, D_out)

    # x_tmp for ALL batch elements in one 2-D MXU matmul.
    # t[n*V + i, e] = sum_d x[n, i, d] * W[d, e]
    t = jnp.dot(x, w, preferred_element_type=f32)                     # (N*V, D_out)

    ones_col = jnp.ones((v, 1), dtype=f32)
    ones_row = jnp.ones((1, v), dtype=f32)

    def normalize(m):
        # Column sums (sum over first index), produced directly in BOTH broadcast
        # orientations via two tiny MXU matvecs (no in-kernel transpose).
        cs_col = lax.dot_general(m, ones_col, (((0,), (0,)), ((), ())),
                                 preferred_element_type=f32)          # (V, 1)
        cs_row = lax.dot_general(ones_row, m, (((1,), (0,)), ((), ())),
                                 preferred_element_type=f32)          # (1, V)
        r_col = lax.rsqrt(cs_col)   # D^-1/2 as a column  (inf/NaN for zero-degree
        r_row = lax.rsqrt(cs_row)   # columns — matches the reference / PyTorch)
        # m_norm[i, j] = r[i] * m[i, j] * r[j]
        return m * r_col * r_row

    if alpha == 1.0:                 # trace-time branch (alpha is a static float)
        m_norm = normalize(adj)
    elif alpha == 0.0:
        m_norm = normalize(jnp.dot(adj, adj, preferred_element_type=f32))
    else:
        adj2 = jnp.dot(adj, adj, preferred_element_type=f32)
        m_norm = alpha * normalize(adj) + (1.0 - alpha) * normalize(adj2)

    # x_out[n, j, e] = sum_i m_norm[i, j] * t[n, i, e]
    # Static unroll over the (tiny) batch dimension; each step is a small 2-D MXU
    # contraction over V with a fused bias + relu epilogue and a sublane-aligned
    # static store.
    for k in range(n):
        t_k = t[k * v:(k + 1) * v, :]                                 # (V, D_out)
        y_k = lax.dot_general(m_norm, t_k, (((0,), (0,)), ((), ())),
                              preferred_element_type=f32)             # (V, D_out)
        o_ref[k * v:(k + 1) * v, :] = jnp.maximum(y_k + b, 0.0).astype(o_ref.dtype)


# ---------------------------------------------------------------------------
# Wrapper: pure-reshape layout plumbing (no transposes, no constants) + one call.
# ---------------------------------------------------------------------------
def graph_convolution(adj, x, weight, bias, alpha=1.0):
    """adj: (V, V), x: (A, B, V, D_in), weight: (D_in, D_out), bias: (D_out,)."""
    if isinstance(alpha, jax.Array):
        raise TypeError("alpha must be a static Python float (trace-time branch).")
    alpha = float(alpha)

    a, b_dim, v, d_in = x.shape
    d_out = weight.shape[1]
    n = a * b_dim

    # Pure reshapes (bitcasts) — no wrapper-side XLA transposes or materialization.
    x2 = x.reshape(n * v, d_in)        # row order [n*V + i]
    bias2 = bias.reshape(1, d_out)

    itemsize = jnp.dtype(x.dtype).itemsize
    flops = (2 * n * v * d_in * d_out          # x @ W
             + 2 * n * v * v * d_out           # m_norm contraction
             + 4 * v * v)                      # normalization matvecs / scaling
    bytes_accessed = (adj.size * jnp.dtype(adj.dtype).itemsize
                      + x.size * itemsize
                      + weight.size * jnp.dtype(weight.dtype).itemsize
                      + bias.size * jnp.dtype(bias.dtype).itemsize
                      + n * v * d_out * itemsize)

    vmem = pltpu.MemorySpace.VMEM
    out2 = pl.pallas_call(
        functools.partial(_gcn_kernel, alpha=alpha, n=n, v=v),
        out_shape=jax.ShapeDtypeStruct((n * v, d_out), x.dtype),
        in_specs=[
            pl.BlockSpec(memory_space=vmem),   # adj    (V, V)
            pl.BlockSpec(memory_space=vmem),   # x      (N*V, D_in)
            pl.BlockSpec(memory_space=vmem),   # weight (D_in, D_out)
            pl.BlockSpec(memory_space=vmem),   # bias   (1, D_out)
        ],
        out_specs=pl.BlockSpec(memory_space=vmem),   # (N*V, D_out)
        cost_estimate=pl.CostEstimate(flops=flops,
                                      transcendentals=2 * v,
                                      bytes_accessed=bytes_accessed),
        compiler_params=pltpu.CompilerParams(vmem_limit_bytes=8 * 1024 * 1024),
    )(adj, x2, weight, bias2)

    # Pure reshape back to (A, B, V, D_out) — row order already matches.
    return out2.reshape(a, b_dim, v, d_out)


# ---------------------------------------------------------------------------
# Pure-JAX reference (mirrors the PyTorch code) for a correctness check.
# ---------------------------------------------------------------------------
def _reference(adj, x, weight, bias, alpha=1.0):
    def normalize(m):
        colsum = jnp.sum(m, axis=0)
        r_inv = colsum ** -0.5
        return m * r_inv[None, :] * r_inv[:, None]

    adj = adj.astype(jnp.float32)
    x = x.astype(jnp.float32)
    m_norm = alpha * normalize(adj) + (1.0 - alpha) * normalize(adj @ adj)
    x_tmp = jnp.einsum('abcd,de->abce', x, weight)
    x_out = jnp.einsum('ij,abid->abjd', m_norm, x_tmp) + bias
    return jnp.maximum(x_out, 0.0)


if __name__ == "__main__":
    # Module hyper-params implied by the forward pass.
    A, B = 2, 4          # leading einsum axes 'a', 'b'
    V = 8                # num_vetex  (axis 'c' of x, and adj is V x V)
    D_IN, D_OUT = 16, 32

    key = jax.random.PRNGKey(0)
    k_adj, k_x, k_w, k_b = jax.random.split(key, 4)

    # Positive adjacency so the D^-1/2 normalization is finite.
    adj = jax.random.uniform(k_adj, (V, V), dtype=jnp.float32) + 0.1
    x = jax.random.normal(k_x, (A, B, V, D_IN), dtype=jnp.float32)

    # Deterministic parameter init: xavier_normal_ for weight, randn for bias.
    xavier_std = (2.0 / (D_IN + D_OUT)) ** 0.5
    weight = jax.random.normal(k_w, (D_IN, D_OUT), dtype=jnp.float32) * xavier_std
    bias = jax.random.normal(k_b, (D_OUT,), dtype=jnp.float32)

    out = graph_convolution(adj, x, weight, bias, alpha=1.0)
    out = jax.block_until_ready(out)

    ref = _reference(adj, x, weight, bias, alpha=1.0)
    assert out.shape == (A, B, V, D_OUT)
    assert out.dtype == x.dtype
    assert jnp.allclose(out, ref, atol=1e-4, rtol=1e-4), "mismatch vs reference"

    print("KERNEL_OK")
</pallas_src>

<mosaic_0001>
module attributes {stable_mosaic.version = 11 : i64} {
  func.func @_gcn_kernel(%arg0: memref<8x8xf32, #tpu.memory_space<vmem>>, %arg1: memref<64x16xf32, #tpu.memory_space<vmem>>, %arg2: memref<16x32xf32, #tpu.memory_space<vmem>>, %arg3: memref<1x32xf32, #tpu.memory_space<vmem>>, %arg4: memref<64x32xf32, #tpu.memory_space<vmem>>) attributes {dimension_semantics = [], scalar_prefetch = 0 : i64, scratch_operands = 0 : i64, tpu.core_type = #tpu.core_type<tc>} {
    %c0 = arith.constant 0 : index
    %c0_0 = arith.constant 0 : index
    %0 = vector.load %arg0[%c0, %c0_0] : memref<8x8xf32, #tpu.memory_space<vmem>>, vector<8x8xf32>
    %c0_1 = arith.constant 0 : index
    %c0_2 = arith.constant 0 : index
    %1 = vector.load %arg1[%c0_1, %c0_2] : memref<64x16xf32, #tpu.memory_space<vmem>>, vector<64x16xf32>
    %c0_3 = arith.constant 0 : index
    %c0_4 = arith.constant 0 : index
    %2 = vector.load %arg2[%c0_3, %c0_4] : memref<16x32xf32, #tpu.memory_space<vmem>>, vector<16x32xf32>
    %c0_5 = arith.constant 0 : index
    %c0_6 = arith.constant 0 : index
    %3 = vector.load %arg3[%c0_5, %c0_6] : memref<1x32xf32, #tpu.memory_space<vmem>>, vector<1x32xf32>
    %cst = arith.constant dense<0.000000e+00> : vector<64x32xf32>
    %4 = tpu.matmul %1, %2, %cst {dimension_numbers = #tpu.dot_dimension_numbers<[1], [0], [0], [1], [0, 0, 1, 1], [], []>} : vector<64x16xf32>, vector<16x32xf32>, vector<64x32xf32> -> vector<64x32xf32>
    %cst_7 = arith.constant 1.000000e+00 : f32
    %5 = vector.broadcast %cst_7 : f32 to vector<8x1xf32>
    %cst_8 = arith.constant 1.000000e+00 : f32
    %6 = vector.broadcast %cst_8 : f32 to vector<1x8xf32>
    %cst_9 = arith.constant dense<0.000000e+00> : vector<8x1xf32>
    %7 = tpu.matmul %0, %5, %cst_9 {dimension_numbers = #tpu.dot_dimension_numbers<[0], [0], [1], [1], [0, 1, 1, 1], [], []>} : vector<8x8xf32>, vector<8x1xf32>, vector<8x1xf32> -> vector<8x1xf32>
    %cst_10 = arith.constant dense<0.000000e+00> : vector<1x8xf32>
    %8 = tpu.matmul %6, %0, %cst_10 {dimension_numbers = #tpu.dot_dimension_numbers<[1], [0], [0], [1], [0, 0, 1, 1], [], []>} : vector<1x8xf32>, vector<8x8xf32>, vector<1x8xf32> -> vector<1x8xf32>
    %9 = math.rsqrt %7 : vector<8x1xf32>
    %10 = math.rsqrt %8 : vector<1x8xf32>
    %11 = vector.broadcast %9 : vector<8x1xf32> to vector<8x8xf32>
    %12 = arith.mulf %0, %11 : vector<8x8xf32>
    %13 = vector.broadcast %10 : vector<1x8xf32> to vector<8x8xf32>
    %14 = arith.mulf %12, %13 : vector<8x8xf32>
    %15 = vector.extract_strided_slice %4 {offsets = [0, 0], sizes = [8, 32], strides = [1, 1]} : vector<64x32xf32> to vector<8x32xf32>
    %cst_11 = arith.constant dense<0.000000e+00> : vector<8x32xf32>
    %16 = tpu.matmul %14, %15, %cst_11 {dimension_numbers = #tpu.dot_dimension_numbers<[0], [0], [1], [1], [0, 1, 1, 1], [], []>} : vector<8x8xf32>, vector<8x32xf32>, vector<8x32xf32> -> vector<8x32xf32>
    %17 = vector.broadcast %3 : vector<1x32xf32> to vector<8x32xf32>
    %18 = arith.addf %16, %17 : vector<8x32xf32>
    %cst_12 = arith.constant 0.000000e+00 : f32
    %19 = vector.broadcast %cst_12 : f32 to vector<8x32xf32>
    %20 = arith.maximumf %18, %19 : vector<8x32xf32>
    %c0_13 = arith.constant 0 : index
    %c0_14 = arith.constant 0 : index
    %21 = vector.load %arg4[%c0_13, %c0_14] : memref<64x32xf32, #tpu.memory_space<vmem>>, vector<8x32xf32>
    tpu.vector_store %arg4[%c0_13, %c0_14], %20 {strides = array<i32>} : memref<64x32xf32, #tpu.memory_space<vmem>>, vector<8x32xf32>,
    %22 = vector.extract_strided_slice %4 {offsets = [8, 0], sizes = [8, 32], strides = [1, 1]} : vector<64x32xf32> to vector<8x32xf32>
    %cst_15 = arith.constant dense<0.000000e+00> : vector<8x32xf32>
    %23 = tpu.matmul %14, %22, %cst_15 {dimension_numbers = #tpu.dot_dimension_numbers<[0], [0], [1], [1], [0, 1, 1, 1], [], []>} : vector<8x8xf32>, vector<8x32xf32>, vector<8x32xf32> -> vector<8x32xf32>
    %24 = vector.broadcast %3 : vector<1x32xf32> to vector<8x32xf32>
    %25 = arith.addf %23, %24 : vector<8x32xf32>
    %cst_16 = arith.constant 0.000000e+00 : f32
    %26 = vector.broadcast %cst_16 : f32 to vector<8x32xf32>
    %27 = arith.maximumf %25, %26 : vector<8x32xf32>
    %c8 = arith.constant 8 : index
    %c0_17 = arith.constant 0 : index
    %28 = vector.load %arg4[%c8, %c0_17] : memref<64x32xf32, #tpu.memory_space<vmem>>, vector<8x32xf32>
    tpu.vector_store %arg4[%c8, %c0_17], %27 {strides = array<i32>} : memref<64x32xf32, #tpu.memory_space<vmem>>, vector<8x32xf32>,
    %29 = vector.extract_strided_slice %4 {offsets = [16, 0], sizes = [8, 32], strides = [1, 1]} : vector<64x32xf32> to vector<8x32xf32>
    %cst_18 = arith.constant dense<0.000000e+00> : vector<8x32xf32>
    %30 = tpu.matmul %14, %29, %cst_18 {dimension_numbers = #tpu.dot_dimension_numbers<[0], [0], [1], [1], [0, 1, 1, 1], [], []>} : vector<8x8xf32>, vector<8x32xf32>, vector<8x32xf32> -> vector<8x32xf32>
    %31 = vector.broadcast %3 : vector<1x32xf32> to vector<8x32xf32>
    %32 = arith.addf %30, %31 : vector<8x32xf32>
    %cst_19 = arith.constant 0.000000e+00 : f32
    %33 = vector.broadcast %cst_19 : f32 to vector<8x32xf32>
    %34 = arith.maximumf %32, %33 : vector<8x32xf32>
    %c16 = arith.constant 16 : index
    %c0_20 = arith.constant 0 : index
    %35 = vector.load %arg4[%c16, %c0_20] : memref<64x32xf32, #tpu.memory_space<vmem>>, vector<8x32xf32>
    tpu.vector_store %arg4[%c16, %c0_20], %34 {strides = array<i32>} : memref<64x32xf32, #tpu.memory_space<vmem>>, vector<8x32xf32>,
    %36 = vector.extract_strided_slice %4 {offsets = [24, 0], sizes = [8, 32], strides = [1, 1]} : vector<64x32xf32> to vector<8x32xf32>
    %cst_21 = arith.constant dense<0.000000e+00> : vector<8x32xf32>
    %37 = tpu.matmul %14, %36, %cst_21 {dimension_numbers = #tpu.dot_dimension_numbers<[0], [0], [1], [1], [0, 1, 1, 1], [], []>} : vector<8x8xf32>, vector<8x32xf32>, vector<8x32xf32> -> vector<8x32xf32>
    %38 = vector.broadcast %3 : vector<1x32xf32> to vector<8x32xf32>
    %39 = arith.addf %37, %38 : vector<8x32xf32>
    %cst_22 = arith.constant 0.000000e+00 : f32
    %40 = vector.broadcast %cst_22 : f32 to vector<8x32xf32>
    %41 = arith.maximumf %39, %40 : vector<8x32xf32>
    %c24 = arith.constant 24 : index
    %c0_23 = arith.constant 0 : index
    %42 = vector.load %arg4[%c24, %c0_23] : memref<64x32xf32, #tpu.memory_space<vmem>>, vector<8x32xf32>
    tpu.vector_store %arg4[%c24, %c0_23], %41 {strides = array<i32>} : memref<64x32xf32, #tpu.memory_space<vmem>>, vector<8x32xf32>,
    %43 = vector.extract_strided_slice %4 {offsets = [32, 0], sizes = [8, 32], strides = [1, 1]} : vector<64x32xf32> to vector<8x32xf32>
    %cst_24 = arith.constant dense<0.000000e+00> : vector<8x32xf32>
    %44 = tpu.matmul %14, %43, %cst_24 {dimension_numbers = #tpu.dot_dimension_numbers<[0], [0], [1], [1], [0, 1, 1, 1], [], []>} : vector<8x8xf32>, vector<8x32xf32>, vector<8x32xf32> -> vector<8x32xf32>
    %45 = vector.broadcast %3 : vector<1x32xf32> to vector<8x32xf32>
    %46 = arith.addf %44, %45 : vector<8x32xf32>
    %cst_25 = arith.constant 0.000000e+00 : f32
    %47 = vector.broadcast %cst_25 : f32 to vector<8x32xf32>
    %48 = arith.maximumf %46, %47 : vector<8x32xf32>
    %c32 = arith.constant 32 : index
    %c0_26 = arith.constant 0 : index
    %49 = vector.load %arg4[%c32, %c0_26] : memref<64x32xf32, #tpu.memory_space<vmem>>, vector<8x32xf32>
    tpu.vector_store %arg4[%c32, %c0_26], %48 {strides = array<i32>} : memref<64x32xf32, #tpu.memory_space<vmem>>, vector<8x32xf32>,
    %50 = vector.extract_strided_slice %4 {offsets = [40, 0], sizes = [8, 32], strides = [1, 1]} : vector<64x32xf32> to vector<8x32xf32>
    %cst_27 = arith.constant dense<0.000000e+00> : vector<8x32xf32>
    %51 = tpu.matmul %14, %50, %cst_27 {dimension_numbers = #tpu.dot_dimension_numbers<[0], [0], [1], [1], [0, 1, 1, 1], [], []>} : vector<8x8xf32>, vector<8x32xf32>, vector<8x32xf32> -> vector<8x32xf32>
    %52 = vector.broadcast %3 : vector<1x32xf32> to vector<8x32xf32>
    %53 = arith.addf %51, %52 : vector<8x32xf32>
    %cst_28 = arith.constant 0.000000e+00 : f32
    %54 = vector.broadcast %cst_28 : f32 to vector<8x32xf32>
    %55 = arith.maximumf %53, %54 : vector<8x32xf32>
    %c40 = arith.constant 40 : index
    %c0_29 = arith.constant 0 : index
    %56 = vector.load %arg4[%c40, %c0_29] : memref<64x32xf32, #tpu.memory_space<vmem>>, vector<8x32xf32>
    tpu.vector_store %arg4[%c40, %c0_29], %55 {strides = array<i32>} : memref<64x32xf32, #tpu.memory_space<vmem>>, vector<8x32xf32>,
    %57 = vector.extract_strided_slice %4 {offsets = [48, 0], sizes = [8, 32], strides = [1, 1]} : vector<64x32xf32> to vector<8x32xf32>
    %cst_30 = arith.constant dense<0.000000e+00> : vector<8x32xf32>
    %58 = tpu.matmul %14, %57, %cst_30 {dimension_numbers = #tpu.dot_dimension_numbers<[0], [0], [1], [1], [0, 1, 1, 1], [], []>} : vector<8x8xf32>, vector<8x32xf32>, vector<8x32xf32> -> vector<8x32xf32>
    %59 = vector.broadcast %3 : vector<1x32xf32> to vector<8x32xf32>
    %60 = arith.addf %58, %59 : vector<8x32xf32>
    %cst_31 = arith.constant 0.000000e+00 : f32
    %61 = vector.broadcast %cst_31 : f32 to vector<8x32xf32>
    %62 = arith.maximumf %60, %61 : vector<8x32xf32>
    %c48 = arith.constant 48 : index
    %c0_32 = arith.constant 0 : index
    %63 = vector.load %arg4[%c48, %c0_32] : memref<64x32xf32, #tpu.memory_space<vmem>>, vector<8x32xf32>
    tpu.vector_store %arg4[%c48, %c0_32], %62 {strides = array<i32>} : memref<64x32xf32, #tpu.memory_space<vmem>>, vector<8x32xf32>,
    %64 = vector.extract_strided_slice %4 {offsets = [56, 0], sizes = [8, 32], strides = [1, 1]} : vector<64x32xf32> to vector<8x32xf32>
    %cst_33 = arith.constant dense<0.000000e+00> : vector<8x32xf32>
    %65 = tpu.matmul %14, %64, %cst_33 {dimension_numbers = #tpu.dot_dimension_numbers<[0], [0], [1], [1], [0, 1, 1, 1], [], []>} : vector<8x8xf32>, vector<8x32xf32>, vector<8x32xf32> -> vector<8x32xf32>
    %66 = vector.broadcast %3 : vector<1x32xf32> to vector<8x32xf32>
    %67 = arith.addf %65, %66 : vector<8x32xf32>
    %cst_34 = arith.constant 0.000000e+00 : f32
    %68 = vector.broadcast %cst_34 : f32 to vector<8x32xf32>
    %69 = arith.maximumf %67, %68 : vector<8x32xf32>
    %c56 = arith.constant 56 : index
    %c0_35 = arith.constant 0 : index
    %70 = vector.load %arg4[%c56, %c0_35] : memref<64x32xf32, #tpu.memory_space<vmem>>, vector<8x32xf32>
    tpu.vector_store %arg4[%c56, %c0_35], %69 {strides = array<i32>} : memref<64x32xf32, #tpu.memory_space<vmem>>, vector<8x32xf32>,
    return
  }
}

</mosaic_0001>

<bundles_post_ra>
// kernel: tpu_custom_call.1
= control target key start
LH: loop header
LB: loop body
LE: loop exit
PB: predicated region body
PF: predicated region fallthrough
CT: control target
= control target key end

     0   :  { %v1101_v1 = vmov 0.0   ;;  %vm1102_vm0 = vmmov 0   ;;  %v1103_v2 = vmov 1.0   ;;  %vm191_vm1 = vcmask 64512   ;;  %s1251_s0 = inlined_call_operand.vmem [shape: f32[8,8], index: 0, kind: input, shape index: {}]   ;;  %s1252_s2 = inlined_call_operand.vmem [shape: f32[16,32], index: 2, kind: input, shape index: {}]   ;;  %s1253_s1 = inlined_call_operand.vmem [shape: f32[64,16], index: 1, kind: input, shape index: {}]   ;;  %s1254_s3 = inlined_call_operand.vmem [shape: f32[1,32], index: 3, kind: input, shape index: {}]   ;;  %s1255_s4 = inlined_call_operand.vmem [shape: f32[64,32], index: 4, kind: output, shape index: {}]  }
   0x1   :  { %v1133_v0 = vld [vmem:[%s1251_s0] sm:$0xff]  ;;  %1038 = vmatprep.subr.mxu1 %v1101_v1  ;;  %1040 = vmatprep.mubr.msk.f32.mxu1 %vm1102_vm0, %v1101_v1  ;;  %v1104_v4 = vmov 0   ;;  %vm29_vm2 = vcmask 130048   ;;  %v27_v6 = vld [vmem:[%s1252_s2 + $0x8] sm:$0xff]  ;;  %v20_v10 = vld [vmem:[%s1253_s1 + $0x10] sm:$0xff]  ;;  %v346_v25 = vlaneseq  ;;  %vm463_vm3 = vcmask 261120  }
   0x2   :  { %159 = vxpose.xlu0.b32.start.end [1/1] (short) (narrow) %v1133_v0, 8  ;;  %1039 = vmatpush3.msra.mxu1 %v1103_v2  ;;  %v26_v5 = vld [vmem:[%s1252_s2] sm:$0xff]  ;;  %v19_v9 = vld [vmem:[%s1253_s1 + $0x8] sm:$0xff]  ;;  %v21_v11 = vld [vmem:[%s1253_s1 + $0x18] sm:$0xff] }
   0x3   :  { %1043 = vmatprep.subr.mxu1 %v1101_v1  ;;  %v18_v7 = vld [vmem:[%s1253_s1] sm:$0xff]  ;;  %v1088_v8 = vpack.c.bf16 %v27_v6, %v26_v5  ;;  %v23_v13 = vld [vmem:[%s1253_s1 + $0x28] sm:$0xff]  ;;  %v24_v14 = vld [vmem:[%s1253_s1 + $0x30] sm:$0xff]  ;;  %v347_v26 = vshrl.u32 %v346_v25, 7 }
   0x4   :  { %1026 = vmatprep.mubr.msk.f32.mxu0 %vm29_vm2, %v18_v7  ;;  %v22_v12 = vld [vmem:[%s1253_s1 + $0x20] sm:$0xff]  ;;  %v25_v15 = vld [vmem:[%s1253_s1 + $0x38] sm:$0xff] }
   0x5   :  { %1089 = vmatprep.subr.bf16.mxu0 %v1088_v8  ;;  %v348_v27 = vsub.s32 0, %v347_v26  ;;  %v983_v38 = vld [vmem:[%s1254_s3] ss:$0 sm:$0xff] }
   0x6   :  { %1091 = vmatpush3.bf16.msra.mxu0 %v1088_v8 }
   0x7   :  { %1063 = vmatprep.subr.mxu0 %v1101_v1 }
   0x9   :  { %1027 = vmatmul.mubr.msk.f32.vlgmr.msra.gmra.mrb[0].mxu0 %vm29_vm2, %v19_v9 }
   0xa   :  { %1029 = vmatprep.mubr.msk.f32.mxu0 %vm29_vm2, %v20_v10 }
   0xd   :  { %1030 = vmatmul.mubr.msk.f32.gmra.mrb[2].mxu0 %vm29_vm2, %v21_v11 }
   0xe   :  { %1032 = vmatprep.mubr.msk.f32.mxu0 %vm29_vm2, %v22_v12 }
  0x11   :  { %1033 = vmatmul.mubr.msk.f32.gmra.mrb[4].mxu0 %vm29_vm2, %v23_v13 }
  0x12   :  { %1035 = vmatprep.mubr.msk.f32.mxu0 %vm29_vm2, %v24_v14 }
  0x15   :  { %1036 = vmatmul.mubr.msk.f32.gmra.mrb[6].mxu0 %vm29_vm2, %v25_v15 }
  0x16   :  { %1065 = vmatprep.mubr.msk.f32.mxu0 %vm1102_vm0, %v1101_v1 }
  0x2b   :  { %1096 = vset.pattern.permute.xlu0 %v1104_v4 }
  0x82   :  { %v175_v3 = vpop.trf.xlu0 }
  0x83   :  { %1041 = vmatmul.mubr.msk.f32.vlgmr.msra.gmra.mrb[0].mxu1 %vm191_vm1, %v175_v3 }
  0x84   :  { %1044 = vmatpush3.msra.mxu1 %v1133_v0  ;;  %1045 = vmatprep.mubr.msk.f32.mxu1 %vm1102_vm0, %v1101_v1 }
  0x85   :  { %1048 = vmatprep.subr.mxu1 %v1101_v1 }
  0x87   :  { %1046 = vmatmul.mubr.msk.f32.vlgmr.msra.gmra.mrb[2].mxu1 %vm191_vm1, %v1103_v2 }
  0x88   :  { %1050 = vmatprep.mubr.msk.f32.mxu1 %vm1102_vm0, %v1101_v1 }
  0xdc   :  { %v1028_v21 = vpop.f32.mrb[0].mxu0 }
  0xdd   :  { %v120_v22 = vpop.f32.mrb[1].mxu0 }
  0xde   :  { %1049 = vmatpush3.msra.mxu1 %v120_v22 }
  0xdf   :  { %1053 = vmatprep.subr.mxu1 %v1101_v1 }
  0xe0   :  { %v1031_v23 = vpop.f32.mrb[2].mxu0 }
  0xe1   :  { %v130_v24 = vpop.f32.mrb[3].mxu0  ;;  %1064 = vmatpush3.msra.mxu0 %v1031_v23 }
  0xe2   :  { %1073 = vmatprep.subr.mxu0 %v1101_v1 }
  0xe4   :  { %v1034_v33 = vpop.f32.mrb[4].mxu0 }
  0xe5   :  { %v140_v34 = vpop.f32.mrb[5].mxu0 }
  0xe8   :  { %v1037_v35 = vpop.f32.mrb[6].mxu0 }
  0xe9   :  { %v150_v36 = vpop.f32.mrb[7].mxu0 }
 0x156   :  { %v261_v16 = vpop.f32.mrb[0].mxu1 }
 0x157   :  { %1097 = vrsqrt.f32 %v261_v16  ;;  %v1042_v17 = vpop.f32.mrb[1].mxu1 }
 0x15a   :  { %v334_v18 = vpop.f32.mrb[2].mxu1 }
 0x15b   :  { %v1047_v19 = vpop.f32.mrb[3].mxu1  ;;  %1099 = vrsqrt.f32 %v334_v18 }
 0x161   :  { %v1098_v20 = vpop.eup %1097 }
 0x162   :  { %342 = vperm.xlu0 %1096, %v1098_v20  }
 0x165   :  { %v1100_v28 = vpop.eup %1099 }
 0x166   :  { %v349_v29 = vrot.slane %v1100_v28, %v348_v27 }
 0x1e1   :  { %v343_v30 = vpop.permute.xlu0 %342 }
 0x1e2   :  { %v345_v31 = vmul.f32 %v343_v30, %v1133_v0 }
 0x1e4   :  { %v350_v32 = vmul.f32 %v349_v29, %v345_v31 }
 0x1e6   :  { %357 = vxpose.xlu1.b32.start.end [1/1] (short) (narrow) %v350_v32, 8 }
 0x266   :  { %v373_v37 = vpop.trf.xlu1 }
 0x267   :  { %1051 = vmatmul.mubr.msk.f32.vlgmr.msra.gmra.mrb[4].mxu1 %vm191_vm1, %v373_v37  ;;  %1066 = vmatmul.mubr.msk.f32.vlgmr.msra.gmra.mrb[8].mxu0 %vm191_vm1, %v373_v37 }
 0x268   :  { %1054 = vmatpush3.msra.mxu1 %v1028_v21  ;;  %1055 = vmatprep.mubr.msk.f32.mxu1 %vm1102_vm0, %v1101_v1 }
 0x269   :  { %1058 = vmatprep.subr.mxu1 %v1101_v1  ;;  %1074 = vmatpush3.msra.mxu0 %v1034_v33 }
 0x26a   :  { %1075 = vmatprep.mubr.msk.f32.mxu0 %vm1102_vm0, %v1101_v1  ;;  %1083 = vmatprep.subr.mxu0 %v1101_v1 }
 0x26b   :  { %1056 = vmatmul.mubr.msk.f32.vlgmr.msra.gmra.mrb[6].mxu1 %vm191_vm1, %v373_v37  ;;  %1076 = vmatmul.mubr.msk.f32.vlgmr.msra.gmra.mrb[10].mxu0 %vm191_vm1, %v373_v37 }
 0x26c   :  { %1059 = vmatpush3.msra.mxu1 %v130_v24  ;;  %1060 = vmatprep.mubr.msk.f32.mxu1 %vm1102_vm0, %v1101_v1 }
 0x26d   :  { %1068 = vmatprep.subr.mxu1 %v1101_v1  ;;  %1084 = vmatpush3.msra.mxu0 %v1037_v35 }
 0x26e   :  { %1085 = vmatprep.mubr.msk.f32.mxu0 %vm1102_vm0, %v1101_v1 }
 0x26f   :  { %1061 = vmatmul.mubr.msk.f32.vlgmr.msra.gmra.mrb[8].mxu1 %vm191_vm1, %v373_v37  ;;  %1086 = vmatmul.mubr.msk.f32.vlgmr.msra.gmra.mrb[12].mxu0 %vm191_vm1, %v373_v37 }
 0x270   :  { %1069 = vmatpush3.msra.mxu1 %v140_v34  ;;  %1070 = vmatprep.mubr.msk.f32.mxu1 %vm1102_vm0, %v1101_v1 }
 0x271   :  { %1078 = vmatprep.subr.mxu1 %v1101_v1 }
 0x273   :  { %1071 = vmatmul.mubr.msk.f32.vlgmr.msra.gmra.mrb[10].mxu1 %vm191_vm1, %v373_v37 }
 0x274   :  { %1079 = vmatpush3.msra.mxu1 %v150_v36  ;;  %1080 = vmatprep.mubr.msk.f32.mxu1 %vm1102_vm0, %v1101_v1 }
 0x277   :  { %1081 = vmatmul.mubr.msk.f32.vlgmr.msra.gmra.mrb[12].mxu1 %vm191_vm1, %v373_v37 }
 0x33a   :  { %v458_v39 = vpop.f32.mrb[4].mxu1  ;;  %v675_v40 = vpop.f32.mrb[8].mxu0 }
 0x33b   :  { %v459_v41 = vadd.f32 %v983_v38, %v458_v39  ;;  %v676_v42 = vadd.f32 %v983_v38, %v675_v40  ;;  %v1052_v43 = vpop.f32.mrb[5].mxu1  ;;  %v1067_v44 = vpop.f32.mrb[9].mxu0 }
 0x33d   :  { %v462_v45 = vmax.f32 %v459_v41, 0.0  ;;  %v679_v46 = vmax.f32 %v676_v42, 0.0 }
 0x33e   :  { %v531_v47 = vpop.f32.mrb[6].mxu1  ;;  %v819_v48 = vpop.f32.mrb[10].mxu0 }
 0x33f   :  { %464 = vst.msk [vmem:[%s1255_s4] sm:$0xff] %vm463_vm3, %v462_v45  ;;  %680 = vst.msk [vmem:[%s1255_s4 + $0x18] sm:$0xff] %vm463_vm3, %v679_v46  ;;  %v532_v49 = vadd.f32 %v983_v38, %v531_v47  ;;  %v820_v50 = vadd.f32 %v983_v38, %v819_v48  ;;  %v1057_v51 = vpop.f32.mrb[7].mxu1  ;;  %v1077_v52 = vpop.f32.mrb[11].mxu0 }
 0x341   :  { %v535_v53 = vmax.f32 %v532_v49, 0.0  ;;  %v823_v54 = vmax.f32 %v820_v50, 0.0 }
 0x342   :  { %v603_v55 = vpop.f32.mrb[8].mxu1  ;;  %v963_v56 = vpop.f32.mrb[12].mxu0 }
 0x343   :  { %536 = vst.msk [vmem:[%s1255_s4 + $0x8] sm:$0xff] %vm463_vm3, %v535_v53  ;;  %824 = vst.msk [vmem:[%s1255_s4 + $0x28] sm:$0xff] %vm463_vm3, %v823_v54  ;;  %v604_v57 = vadd.f32 %v983_v38, %v603_v55  ;;  %v964_v58 = vadd.f32 %v983_v38, %v963_v56  ;;  %v1062_v59 = vpop.f32.mrb[9].mxu1  ;;  %v1087_v60 = vpop.f32.mrb[13].mxu0 }
 0x345   :  { %v607_v61 = vmax.f32 %v604_v57, 0.0  ;;  %v967_v62 = vmax.f32 %v964_v58, 0.0 }
 0x346   :  { %v747_v63 = vpop.f32.mrb[10].mxu1 }
 0x347   :  { %608 = vst.msk [vmem:[%s1255_s4 + $0x10] sm:$0xff] %vm463_vm3, %v607_v61  ;;  %968 = vst.msk [vmem:[%s1255_s4 + $0x38] sm:$0xff] %vm463_vm3, %v967_v62  ;;  %v748_v0 = vadd.f32 %v983_v38, %v747_v63  ;;  %v1072_v1 = vpop.f32.mrb[11].mxu1 }
 0x349   :  { %v751_v2 = vmax.f32 %v748_v0, 0.0 }
 0x34a   :  { %v891_v3 = vpop.f32.mrb[12].mxu1 }
 0x34b   :  { %752 = vst.msk [vmem:[%s1255_s4 + $0x20] sm:$0xff] %vm463_vm3, %v751_v2  ;;  %v892_v4 = vadd.f32 %v983_v38, %v891_v3  ;;  %v1082_v5 = vpop.f32.mrb[13].mxu1 }
 0x34d   :  { %v895_v6 = vmax.f32 %v892_v4, 0.0 }
 0x34f   :  { %896 = vst.msk [vmem:[%s1255_s4 + $0x30] sm:$0xff] %vm463_vm3, %v895_v6 }

</bundles_post_ra>
